<compile_context>
chip_gen: v7x
topology: tpu7x:2x2x1
jax: 0.10.0
libtpu: 0.0.40
codegen_flags: <defaults>
</compile_context>

<pallas_src>
import functools

import jax
import jax.numpy as jnp
from jax import lax
from jax.experimental import pallas as pl
from jax.experimental.pallas import tpu as pltpu

EPS = 1e-5  # nn.BatchNorm1d default eps


# ---------------------------------------------------------------------------
# VMEM budgeting (generation aware)
# ---------------------------------------------------------------------------
def _vmem_budget():
    """Returns (vmem_limit_bytes, target_block_bytes)."""
    try:
        cap = int(pltpu.get_tpu_info().vmem_capacity_bytes)  # 128 MiB v5e/v6e, 64 MiB v7x
    except Exception:
        cap = 64 << 20                                       # conservative, valid everywhere
    limit = max(32 << 20, min(cap - (16 << 20), 96 << 20))   # leave >= 16 MiB headroom
    # 2x double-buffered input blocks + 2x output blocks + ~50% slack for
    # gamma/beta blocks and Mosaic internal scratch.
    target_block = limit // 6
    return limit, target_block


def _sublane_pack(itemsize):
    # native sublane packing: f32 -> 8, bf16/f16 -> 16, int8/fp8 -> 32
    return max(8, 32 // max(1, itemsize))


def _pick_channel_tile(N, C, L, itemsize, target_block_bytes):
    """Channel tile for the single-pass path (whole (N, L) extent per block).

    Returns None when even the smallest legal channel tile would blow the VMEM
    budget; the caller then switches to the two-pass (stats + apply) path.
    """
    pack = _sublane_pack(itemsize)
    bpc = max(1, N * L * itemsize)          # bytes per channel
    min_tc = C if C <= 8 else 8             # smallest legal channel tile
    if min_tc * bpc > target_block_bytes:
        return None

    tc_fit = target_block_bytes // bpc
    if tc_fit >= C:
        tc = C
    else:
        tc = (tc_fit // pack) * pack
        if tc == 0:
            tc = (tc_fit // 8) * 8
        if tc == 0:
            tc = 8
        tc = min(tc, C)

    # Megacore (v7x): guarantee >= 2 grid steps when the channel count allows it
    # so both TensorCores stream data (harmless single-core on v5e/v6e).
    if tc == C and C >= 2 * pack:
        half = -(-C // 2)                   # ceil(C / 2)
        tc = -(-half // pack) * pack        # round up to the sublane packing
        if tc >= C:
            tc = C
    return tc


def _pick_two_pass_tiles(N, C, L, itemsize, target_block_bytes):
    """(tc, tl) tiles for the two-pass path (L tiled in multiples of 128)."""
    pack = _sublane_pack(itemsize)
    tc = C if C <= pack else pack
    per_l_bytes = max(1, N * tc * itemsize)
    tl = (target_block_bytes // per_l_bytes) // 128 * 128
    tl = max(128, tl)
    if tl >= L:
        tl = L
    else:
        # grow the channel tile with any leftover budget
        per_c_bytes = max(1, N * tl * itemsize)
        tc_fit = (target_block_bytes // per_c_bytes) // pack * pack
        if tc_fit >= C:
            tc = C
        elif tc_fit > tc:
            tc = tc_fit
    # TODO(synk): also tile the batch axis when N alone makes (N, tc, 128) blocks
    # exceed the VMEM budget.
    return tc, tl


# ---------------------------------------------------------------------------
# Kernels
# ---------------------------------------------------------------------------
def _bn_relu_fused_kernel(x_ref, gamma_ref, beta_ref, o_ref, *, n_total):
    # x_ref / o_ref: (N, tc, L)   gamma_ref / beta_ref: (tc, 1)
    x = x_ref[...]
    xf = x if x.dtype == jnp.float32 else x.astype(jnp.float32)

    inv_n = jnp.float32(1.0 / n_total)
    s1 = jnp.sum(xf, axis=(0, 2), keepdims=True)        # (1, tc, 1)
    s2 = jnp.sum(xf * xf, axis=(0, 2), keepdims=True)   # (1, tc, 1)
    mean = s1 * inv_n
    var = jnp.maximum(s2 * inv_n - mean * mean, 0.0)     # biased variance, clamped
    inv_std = lax.rsqrt(var + EPS)

    gamma = gamma_ref[...][None, :, :]                   # (1, tc, 1)
    beta = beta_ref[...][None, :, :]
    scale = inv_std * gamma
    shift = beta - mean * scale

    if x.dtype == jnp.float32:
        y = jnp.maximum(x * scale + shift, 0.0)
    else:
        # low-precision epilogue: apply in the input dtype (bf16-native VALU on
        # v6e/v7x); per-channel scale/shift stay f32-accurate and are cast once.
        y = jnp.maximum(x * scale.astype(x.dtype) + shift.astype(x.dtype), 0.0)
    o_ref[...] = y.astype(o_ref.dtype)


def _bn_stats_kernel(x_ref, gamma_ref, beta_ref, scale_ref, shift_ref,
                     s1_ref, s2_ref, *, n_total, L, tl):
    # grid = (C tiles, L tiles); reduction axis (L) last, marked "arbitrary".
    l = pl.program_id(1)

    @pl.when(l == 0)
    def _init():
        s1_ref[...] = jnp.zeros_like(s1_ref)
        s2_ref[...] = jnp.zeros_like(s2_ref)

    x = x_ref[...]
    if x.dtype != jnp.float32:
        x = x.astype(jnp.float32)
    if L % tl != 0:
        # Last L tile is padded with unspecified data -> mask it out of the sums.
        lane = lax.broadcasted_iota(jnp.int32, x.shape, 2) + l * tl
        x = jnp.where(lane < L, x, 0.0)

    s1_ref[...] += jnp.sum(x, axis=(0, 2), keepdims=True)[0]        # (tc, 1)
    s2_ref[...] += jnp.sum(x * x, axis=(0, 2), keepdims=True)[0]    # (tc, 1)

    @pl.when(l == pl.num_programs(1) - 1)
    def _finalize():
        inv_n = jnp.float32(1.0 / n_total)
        mean = s1_ref[...] * inv_n
        var = jnp.maximum(s2_ref[...] * inv_n - mean * mean, 0.0)
        s = lax.rsqrt(var + EPS) * gamma_ref[...]
        scale_ref[...] = s
        shift_ref[...] = beta_ref[...] - mean * s


def _bn_apply_kernel(x_ref, scale_ref, shift_ref, o_ref):
    x = x_ref[...]
    scale = scale_ref[...][None, :, :]       # (1, tc, 1)
    shift = shift_ref[...][None, :, :]
    if x.dtype != jnp.float32:
        scale = scale.astype(x.dtype)
        shift = shift.astype(x.dtype)
    o_ref[...] = jnp.maximum(x * scale + shift, 0.0).astype(o_ref.dtype)


# ---------------------------------------------------------------------------
# Wrapper
# ---------------------------------------------------------------------------
def bn_relu(x, gamma, beta, *, force_two_pass=False, _target_block_bytes=None):
    """BatchNorm1d(track_running_stats=False) + ReLU.

    x: (N, C, L).  gamma, beta: (C,).  Returns (N, C, L) in x.dtype.
    """
    N, C, L = x.shape
    itemsize = jnp.dtype(x.dtype).itemsize
    vmem_limit, target_block = _vmem_budget()
    if _target_block_bytes is not None:
        target_block = _target_block_bytes

    gamma2 = gamma.reshape(C, 1).astype(jnp.float32)
    beta2 = beta.reshape(C, 1).astype(jnp.float32)

    tc = None if force_two_pass else _pick_channel_tile(N, C, L, itemsize, target_block)

    if tc is not None:
        # ---- single-pass fused path: 1 HBM read + 1 HBM write of x ----------
        grid = (pl.cdiv(C, tc),)
        kernel = functools.partial(_bn_relu_fused_kernel, n_total=N * L)
        return pl.pallas_call(
            kernel,
            out_shape=jax.ShapeDtypeStruct((N, C, L), x.dtype),
            grid=grid,
            in_specs=[
                pl.BlockSpec((N, tc, L), lambda i: (0, i, 0)),
                pl.BlockSpec((tc, 1), lambda i: (i, 0)),
                pl.BlockSpec((tc, 1), lambda i: (i, 0)),
            ],
            out_specs=pl.BlockSpec((N, tc, L), lambda i: (0, i, 0)),
            compiler_params=pltpu.CompilerParams(
                dimension_semantics=("parallel",),
                vmem_limit_bytes=vmem_limit,
            ),
        )(x, gamma2, beta2)

    # ---- two-pass path (large N*L): stats pass + apply pass -----------------
    tc, tl = _pick_two_pass_tiles(N, C, L, itemsize, target_block)
    grid = (pl.cdiv(C, tc), pl.cdiv(L, tl))

    stats_kernel = functools.partial(_bn_stats_kernel, n_total=N * L, L=L, tl=tl)
    scale, shift = pl.pallas_call(
        stats_kernel,
        out_shape=(jax.ShapeDtypeStruct((C, 1), jnp.float32),
                   jax.ShapeDtypeStruct((C, 1), jnp.float32)),
        grid=grid,
        in_specs=[
            pl.BlockSpec((N, tc, tl), lambda c, l: (0, c, l)),
            pl.BlockSpec((tc, 1), lambda c, l: (c, 0)),
            pl.BlockSpec((tc, 1), lambda c, l: (c, 0)),
        ],
        out_specs=(pl.BlockSpec((tc, 1), lambda c, l: (c, 0)),
                   pl.BlockSpec((tc, 1), lambda c, l: (c, 0))),
        scratch_shapes=[pltpu.VMEM((tc, 1), jnp.float32),
                        pltpu.VMEM((tc, 1), jnp.float32)],
        compiler_params=pltpu.CompilerParams(
            dimension_semantics=("parallel", "arbitrary"),
            vmem_limit_bytes=vmem_limit,
        ),
    )(x, gamma2, beta2)

    return pl.pallas_call(
        _bn_apply_kernel,
        out_shape=jax.ShapeDtypeStruct((N, C, L), x.dtype),
        grid=grid,
        in_specs=[
            pl.BlockSpec((N, tc, tl), lambda c, l: (0, c, l)),
            pl.BlockSpec((tc, 1), lambda c, l: (c, 0)),
            pl.BlockSpec((tc, 1), lambda c, l: (c, 0)),
        ],
        out_specs=pl.BlockSpec((N, tc, tl), lambda c, l: (0, c, l)),
        compiler_params=pltpu.CompilerParams(
            dimension_semantics=("parallel", "parallel"),
            vmem_limit_bytes=vmem_limit,
        ),
    )(x, scale, shift)


# ---------------------------------------------------------------------------
# Self-test
# ---------------------------------------------------------------------------
def _reference(x, gamma, beta):
    C = x.shape[1]
    mean = jnp.mean(x, axis=(0, 2), keepdims=True)
    var = jnp.mean((x - mean) ** 2, axis=(0, 2), keepdims=True)
    y = (x - mean) / jnp.sqrt(var + EPS) * gamma.reshape(1, C, 1) + beta.reshape(1, C, 1)
    return jnp.maximum(y, 0.0)


if __name__ == "__main__":
    key = jax.random.PRNGKey(0)
    k1, k2 = jax.random.split(key)

    # --- test 1: single-pass fused path, module-sized small shapes -----------
    N, C, L = 2, 4, 16
    x = jax.random.normal(k1, (N, C, L), dtype=jnp.float32)
    gamma = 1.0 + 0.1 * jnp.arange(C, dtype=jnp.float32)
    beta = 0.05 * jnp.arange(C, dtype=jnp.float32)

    out = jax.block_until_ready(bn_relu(x, gamma, beta))
    ref = _reference(x, gamma, beta)
    assert out.shape == (N, C, L)
    assert jnp.allclose(out, ref, atol=1e-5, rtol=1e-5), "single-pass mismatch"

    # --- test 2: two-pass (stats + apply) fallback path, forced --------------
    N2, C2, L2 = 2, 8, 200
    x2 = jax.random.normal(k2, (N2, C2, L2), dtype=jnp.float32)
    g2 = 1.0 + 0.1 * jnp.arange(C2, dtype=jnp.float32)
    b2 = 0.05 * jnp.arange(C2, dtype=jnp.float32)

    out2 = jax.block_until_ready(
        bn_relu(x2, g2, b2, force_two_pass=True, _target_block_bytes=8192))
    ref2 = _reference(x2, g2, b2)
    assert out2.shape == (N2, C2, L2)
    assert jnp.allclose(out2, ref2, atol=2e-5, rtol=1e-5), "two-pass mismatch"

    print("KERNEL_OK")
</pallas_src>

<mosaic_0001>
module attributes {stable_mosaic.version = 11 : i64} {
  func.func @_bn_relu_fused_kernel(%arg0: i32, %arg1: memref<2x4x16xf32, #tpu.memory_space<vmem>>, %arg2: memref<4x1xf32, #tpu.memory_space<vmem>>, %arg3: memref<4x1xf32, #tpu.memory_space<vmem>>, %arg4: memref<2x4x16xf32, #tpu.memory_space<vmem>>) attributes {dimension_semantics = [#tpu.dimension_semantics<parallel>], iteration_bounds = array<i64: 1>, scalar_prefetch = 0 : i64, scratch_operands = 0 : i64, tpu.core_type = #tpu.core_type<tc>, window_params = [{transform_indices = @transform_0, window_bounds = array<i64: 2, 4, 16>}, {transform_indices = @transform_1, window_bounds = array<i64: 4, 1>}, {transform_indices = @transform_2, window_bounds = array<i64: 4, 1>}, {transform_indices = @transform_3, window_bounds = array<i64: 2, 4, 16>}]} {
    %c0 = arith.constant 0 : index
    %c0_0 = arith.constant 0 : index
    %c0_1 = arith.constant 0 : index
    %0 = vector.load %arg1[%c0, %c0_0, %c0_1] : memref<2x4x16xf32, #tpu.memory_space<vmem>>, vector<2x4x16xf32>
    %cst = arith.constant dense<0.000000e+00> : vector<4xf32>
    %1 = vector.multi_reduction <add>, %0, %cst [0, 2] : vector<2x4x16xf32> to vector<4xf32>
    %2 = vector.shape_cast %1 : vector<4xf32> to vector<1x4x1xf32>
    %3 = arith.mulf %0, %0 : vector<2x4x16xf32>
    %cst_2 = arith.constant dense<0.000000e+00> : vector<4xf32>
    %4 = vector.multi_reduction <add>, %3, %cst_2 [0, 2] : vector<2x4x16xf32> to vector<4xf32>
    %5 = vector.shape_cast %4 : vector<4xf32> to vector<1x4x1xf32>
    %cst_3 = arith.constant 3.125000e-02 : f32
    %6 = vector.broadcast %cst_3 : f32 to vector<1x4x1xf32>
    %7 = arith.mulf %2, %6 : vector<1x4x1xf32>
    %cst_4 = arith.constant 3.125000e-02 : f32
    %8 = vector.broadcast %cst_4 : f32 to vector<1x4x1xf32>
    %9 = arith.mulf %5, %8 : vector<1x4x1xf32>
    %10 = arith.mulf %7, %7 : vector<1x4x1xf32>
    %11 = arith.subf %9, %10 : vector<1x4x1xf32>
    %cst_5 = arith.constant 0.000000e+00 : f32
    %12 = vector.broadcast %cst_5 : f32 to vector<1x4x1xf32>
    %13 = arith.maximumf %11, %12 : vector<1x4x1xf32>
    %cst_6 = arith.constant 9.99999974E-6 : f32
    %14 = vector.broadcast %cst_6 : f32 to vector<1x4x1xf32>
    %15 = arith.addf %13, %14 : vector<1x4x1xf32>
    %16 = math.rsqrt %15 : vector<1x4x1xf32>
    %c0_7 = arith.constant 0 : index
    %c0_8 = arith.constant 0 : index
    %17 = vector.load %arg2[%c0_7, %c0_8] : memref<4x1xf32, #tpu.memory_space<vmem>>, vector<4x1xf32>
    %18 = vector.shape_cast %17 : vector<4x1xf32> to vector<1x4x1xf32>
    %c0_9 = arith.constant 0 : index
    %c0_10 = arith.constant 0 : index
    %19 = vector.load %arg3[%c0_9, %c0_10] : memref<4x1xf32, #tpu.memory_space<vmem>>, vector<4x1xf32>
    %20 = vector.shape_cast %19 : vector<4x1xf32> to vector<1x4x1xf32>
    %21 = arith.mulf %16, %18 : vector<1x4x1xf32>
    %22 = arith.mulf %7, %21 : vector<1x4x1xf32>
    %23 = arith.subf %20, %22 : vector<1x4x1xf32>
    %24 = vector.broadcast %21 : vector<1x4x1xf32> to vector<2x4x16xf32>
    %25 = arith.mulf %0, %24 : vector<2x4x16xf32>
    %26 = vector.broadcast %23 : vector<1x4x1xf32> to vector<2x4x16xf32>
    %27 = arith.addf %25, %26 : vector<2x4x16xf32>
    %cst_11 = arith.constant 0.000000e+00 : f32
    %28 = vector.broadcast %cst_11 : f32 to vector<2x4x16xf32>
    %29 = arith.maximumf %27, %28 : vector<2x4x16xf32>
    %c0_12 = arith.constant 0 : index
    %c0_13 = arith.constant 0 : index
    %c0_14 = arith.constant 0 : index
    %30 = vector.load %arg4[%c0_12, %c0_13, %c0_14] : memref<2x4x16xf32, #tpu.memory_space<vmem>>, vector<2x4x16xf32>
    tpu.vector_store %arg4[%c0_12, %c0_13, %c0_14], %29 {strides = array<i32>} : memref<2x4x16xf32, #tpu.memory_space<vmem>>, vector<2x4x16xf32>,
    return
  }
  func.func @transform_0(%arg0: i32) -> (i32, i32, i32) {
    %c0_i32 = arith.constant 0 : i32
    %c0_i32_0 = arith.constant 0 : i32
    %c0_i32_1 = arith.constant 0 : i32
    return %c0_i32, %arg0, %c0_i32_0 : i32, i32, i32
  }
  func.func @transform_1(%arg0: i32) -> (i32, i32) {
    %c0_i32 = arith.constant 0 : i32
    %c0_i32_0 = arith.constant 0 : i32
    return %arg0, %c0_i32 : i32, i32
  }
  func.func @transform_2(%arg0: i32) -> (i32, i32) {
    %c0_i32 = arith.constant 0 : i32
    %c0_i32_0 = arith.constant 0 : i32
    return %arg0, %c0_i32 : i32, i32
  }
  func.func @transform_3(%arg0: i32) -> (i32, i32, i32) {
    %c0_i32 = arith.constant 0 : i32
    %c0_i32_0 = arith.constant 0 : i32
    %c0_i32_1 = arith.constant 0 : i32
    return %c0_i32, %arg0, %c0_i32_0 : i32, i32, i32
  }
}

</mosaic_0001>

<bundles_post_ra>
// kernel: tpu_custom_call.1
= control target key start
LH: loop header
LB: loop body
LE: loop exit
PB: predicated region body
PF: predicated region fallthrough
CT: control target
= control target key end

     0   :  { %vm17_vm0 = vcmask 125952   ;;  %s162_s0 = inlined_call_operand.vmem [shape: f32[2,4,16], index: 0, kind: input, shape index: {}]   ;;  %s163_s1 = inlined_call_operand.vmem [shape: f32[4,1], index: 1, kind: input, shape index: {}]   ;;  %s164_s2 = inlined_call_operand.vmem [shape: f32[4,1], index: 2, kind: input, shape index: {}]   ;;  %s165_s3 = inlined_call_operand.hbm [shape: f32[2,4,16], index: 3, kind: output, shape index: {}]  }
   0x1   :  { %v15_v0 = vld [vmem:[%s162_s0] sm:$0xf]  ;;  %v16_v1 = vld [vmem:[%s162_s0 + $0x4] sm:$0xf] }
   0x2   :  { %v18_v2 = vsel %vm17_vm0, %v15_v0, 0.0  ;;  %v19_v3 = vsel %vm17_vm0, %v16_v1, 0.0  ;;  %v23_v4 = vmul.f32 %v15_v0, %v15_v0  ;;  %v24_v5 = vmul.f32 %v16_v1, %v16_v1 }
   0x3   :  { %8 = vsyncpa [#allocation3], 0  ;;  %v20_v6 = vadd.f32 %v19_v3, %v18_v2  ;;  %v108_v10 = vmov 0   ;;  %v37_v19 = vld [vmem:[%s163_s1] sm:$0xf]  ;;  %s109_s19 = smov [#allocation2]  }
   0x4   :  { %v25_v7 = vsel %vm17_vm0, %v23_v4, 0.0  ;;  %v26_v8 = vsel %vm17_vm0, %v24_v5, 0.0  ;;  %80 = vset.pattern.permute.xlu1 %v108_v10  ;;  %81 = vset.pattern.permute.xlu0 %v108_v10  ;;  %v38_v22 = vld [vmem:[%s164_s2] sm:$0xf]  ;;  %s65_s20 = sshll.u32 %s109_s19, 4  ;;  %s66_s20 = int_to_ptr.vmem [resolvable:$true] %s65_s20 }
   0x5   :  { %21 = vadd.xlane.f32.xlu0 %v20_v6  ;;  %v27_v9 = vadd.f32 %v26_v8, %v25_v7  ;;  %s84_s1 = scalar_lea.vmem %s66_s20, 128  ;;  %p89_p1 = scmp.lt.s32.totalorder %s66_s20, %s66_s20 }
   0x6   :  { %p85_p0 = scmp.ne.s32.totalorder %s66_s20, %s84_s1  ;;  %p90_p2 = scmp.lt.s32.totalorder %s84_s1, %s84_s1 }
   0x8   :  { %p91_p3 = por %p90_p2, %p89_p1 }
   0x9   :  { %28 = vadd.xlane.f32.xlu0 %v27_v9 }
   0xa   :  { %p92_p4 = pnand %p91_p3, %p85_p0 }
  0x92   :  { %v22_v11 = vpop.xlane.xlu0 %21 }
  0x93   :  { %v30_v12 = vmul.f32 0.03125, %v22_v11 }
  0x95   :  { %v32_v14 = vmul.f32 %v30_v12, %v30_v12 }
  0x96   :  { %v29_v13 = vpop.xlane.xlu0 %28 }
  0x97   :  { %v31_v15 = vmul.f32 0.03125, %v29_v13 }
  0x99   :  { %v33_v16 = vsub.f32 %v31_v15, %v32_v14 }
  0x9b   :  { %v34_v17 = vmax.f32 %v33_v16, 0.0 }
  0x9d   :  { %v35_v18 = vadd.f32 1e-05, %v34_v17 }
  0x9f   :  { %82 = vrsqrt.f32 %v35_v18 }
  0xa9   :  { %v83_v20 = vpop.eup %82 }
  0xaa   :  { %v39_v21 = vmul.f32 %v83_v20, %v37_v19 }
  0xac   :  { %44 = vperm.xlu1 %80, %v39_v21   ;;  %v40_v23 = vmul.f32 %v39_v21, %v30_v12 }
  0xae   :  { %v41_v24 = vsub.f32 %v38_v22, %v40_v23 }
  0xb0   :  { %51 = vperm.xlu1 %80, %v41_v24  }
 0x12b   :  { %v45_v25 = vpop.permute.xlu1 %44 }
 0x12c   :  { %v47_v26 = vmul.f32 %v45_v25, %v15_v0  ;;  %v48_v27 = vmul.f32 %v45_v25, %v16_v1 }
 0x12f   :  { %v52_v28 = vpop.permute.xlu1 %51 }
 0x130   :  { %v54_v29 = vadd.f32 %v52_v28, %v47_v26  ;;  %v55_v30 = vadd.f32 %v52_v28, %v48_v27 }
 0x132   :  { %v56_v31 = vmax.f32 %v54_v29, 0.0  ;;  %v57_v32 = vmax.f32 %v55_v30, 0.0 }
 0x134   :  { %58 = vst.msk [vmem:[#allocation2] sm:$0xf] %vm17_vm0, %v56_v31  ;;  %59 = vst.msk [vmem:[#allocation2 + $0x4] sm:$0xf] %vm17_vm0, %v57_v32 }
 0x135   :  { %95 = shalt.err (!%p92_p4)
}
 0x136   :  { %s96_s22 = scalar_lea.hbm %s165_s3, 128 }
 0x137   :  { %p97_p5 = scmp.ne.s32.totalorder %s165_s3, %s96_s22  ;;  %p100_p6 = scmp.lt.u32.totalorder %s96_s22, %s165_s3 }
 0x139   :  { %p102_p7 = pnand %p100_p6, %p97_p5 }
 0x13b   :  { %105 = shalt.err (!%p102_p7)
}
 0x13c   :  { %s110_s27 = smov 64   ;;  %s111_s28 = smov 4  }
 0x13d   :  { %71 = dma.vmem_to_hbm [thread:$0]  %s66_s20, 128, %s165_s3, [#allocation3], %s110_s27, %s110_s27, %s111_s28  }
 0x13e   :  { %106 = dma.done.wait [#allocation3], 128  }
 0x13f   :  { %107 = vsyncadd [#allocation3], 4294967168 }
 0x140   :  { %75 = vsyncpa [#allocation3], 1 }

</bundles_post_ra>
